<compile_context>
chip_gen: v7x
topology: tpu7x:2x2x1
jax: 0.10.0
libtpu: 0.0.40
codegen_flags: <defaults>
</compile_context>

<pallas_src>
import functools

import jax
import jax.numpy as jnp
from jax import lax
from jax.experimental import pallas as pl
from jax.experimental.pallas import tpu as pltpu


def _loss_kernel(inp_ref, tgt_ref, x_ref, ce_ref, gst_ref,
                 prev_lp_ref, prev_x_ref, *, threshold, sigma, tl):
    l = pl.program_id(1)
    thr2 = float(threshold) ** 2
    inv = 1.0 / (2.0 * float(sigma) ** 2)          # trace-time constant (mul, not div)

    logits = inp_ref[0].astype(jnp.float32)        # (C, TL)
    xv = x_ref[0].astype(jnp.float32)              # (D, TL)

    # target row is VMEM-resident for the full sequence; slice this tile's window
    start = pl.multiple_of(l * tl, 128)
    tgt = tgt_ref[0, :, pl.ds(start, tl)]          # (1, TL) int32

    # ---- log_softmax over the class dim (sublane axis) ----
    m = jnp.max(logits, axis=0, keepdims=True)
    z = logits - m
    lse = jnp.log(jnp.sum(jnp.exp(z), axis=0, keepdims=True))
    logp = z - lse                                 # (C, TL)

    # ---- cross entropy: one full-tile-to-scalar reduce ----
    cls = lax.broadcasted_iota(jnp.int32, logp.shape, 0)
    ce_sum = -jnp.sum(jnp.where(cls == tgt, logp, 0.0))

    # ---- temporal truncated MSE * gaussian similarity (within this tile) ----
    # XLU roll keeps full lane-aligned shapes: column i pairs with column
    # (i+1) mod TL, i.e. lane TL-1 is the spurious wrap-around pair.
    lp_next = pltpu.roll(logp, shift=tl - 1, axis=1)
    d = lp_next - logp
    # class-sum BEFORE multiplying by the class-independent similarity
    mse_col = jnp.sum(jnp.minimum(d * d, thr2), axis=0, keepdims=True)   # (1, TL)

    x_next = pltpu.roll(xv, shift=tl - 1, axis=1)
    xd = x_next - xv
    norm = jnp.sqrt(jnp.sum(xd * xd, axis=0, keepdims=True))             # (1, TL)
    sim = jnp.exp(-norm * inv)                                           # (1, TL)

    # Mask the wrap-around lane with a single VPU compare+select (replaces the
    # old narrow-column pair_term subtraction).
    lane = lax.broadcasted_iota(jnp.int32, (1, tl), 1)
    gst_step = jnp.sum(jnp.where(lane < tl - 1, sim * mse_col, 0.0))

    @pl.when(l == 0)
    def _():
        ce_ref[...] = jnp.zeros_like(ce_ref)
        gst_ref[...] = jnp.zeros_like(gst_ref)

    ce_ref[...] = ce_ref[...] + ce_sum
    gst_ref[...] = gst_ref[...] + gst_step

    @pl.when(l > 0)
    def _():
        # cross-tile boundary pair: previous tile's last column vs this tile's
        # first column (uses the carried columns from the previous L-tile).
        dd = logp[:, 0:1] - prev_lp_ref[...]
        pm = jnp.sum(jnp.minimum(dd * dd, thr2))
        xdd = xv[:, 0:1] - prev_x_ref[...]
        pn = jnp.sqrt(jnp.sum(xdd * xdd))
        gst_ref[...] = gst_ref[...] + jnp.exp(-pn * inv) * pm

    # carry this tile's last column for the next L-tile of the same batch element
    prev_lp_ref[...] = logp[:, tl - 1:tl]
    prev_x_ref[...] = xv[:, tl - 1:tl]


def _tpu_vmem_capacity_bytes():
    try:
        info = pltpu.get_tpu_info()
        cap = int(getattr(info, "vmem_capacity_bytes", 0) or 0)
        if cap > 0:
            return cap
    except Exception:
        pass
    return 128 * 2**20


def _working_set_bytes_per_col(C, D, in_itemsize=4, x_itemsize=4):
    """Per-lane-column bytes: double-buffered input blocks + live f32 temporaries
    (logp / z-exp / lp_next / d are logits-sized; x_next / xd are feature-sized)
    + a handful of (1, TL) row vectors."""
    inputs = 2 * (C * in_itemsize + D * x_itemsize)
    temps = 4 * (4 * C + 2 * D + 8)
    return inputs + temps


def _choose_tile_len(L, per_col_bytes, budget_bytes):
    """Largest lane-aligned (multiple-of-128) tile length that divides L and keeps
    the per-tile working set under `budget_bytes`."""
    if L % 128 != 0:
        # TODO(synk): ragged last tile (L not a multiple of 128) falls back to a
        # single whole-L block per batch element.
        return L
    max_tl = max(128, (budget_bytes // per_col_bytes) // 128 * 128)
    nlanes = L // 128
    best = 128
    for f in range(1, nlanes + 1):
        if nlanes % f == 0 and f * 128 <= max_tl:
            best = f * 128
    return best


def cross_entropy_gstmse_loss(inp, target, x, *, gstmse_weight=0.15,
                              threshold=4, sigma=1.0, tl=None):
    """JAX/Pallas equivalent of CrossEntropyWithGaussianSimilarityTruncatedMSE.

    inp:    (N, C, L)    float logits (f32 or bf16; bf16 halves HBM traffic)
    target: (N, L)       int class indices
    x:      (N, 1, D, L) float features (dim 1 squeezed, matching torch)
    Returns a scalar float32 loss.
    """
    inp = jnp.asarray(inp)
    if not jnp.issubdtype(inp.dtype, jnp.floating):
        inp = inp.astype(jnp.float32)
    N, C, L = inp.shape
    xs = jnp.squeeze(jnp.asarray(x), axis=1)                    # (N, D, L)
    if not jnp.issubdtype(xs.dtype, jnp.floating):
        xs = xs.astype(jnp.float32)
    D = xs.shape[1]
    tgt = jnp.asarray(target, jnp.int32).reshape(N, 1, L)

    # ---- generation-aware VMEM budgeting ----
    cap = _tpu_vmem_capacity_bytes()
    if cap <= 64 * 2**20:          # v7x-class TensorCore: 64 MiB physical VMEM
        budget_bytes, limit_cap = 24 * 2**20, 56 * 2**20
    else:                          # v5e / v6e: 128 MiB physical VMEM
        budget_bytes, limit_cap = 48 * 2**20, 100 * 2**20

    per_col = _working_set_bytes_per_col(C, D, inp.dtype.itemsize, xs.dtype.itemsize)
    if tl is None:
        tl = _choose_tile_len(L, per_col, budget_bytes)
    if L % tl != 0 or (tl != L and tl % 128 != 0):
        raise ValueError(f"tile length {tl} must divide L={L} and be a multiple "
                         f"of 128 (or equal L)")
    num_lt = L // tl

    # Limit scales with the actual working set (inputs + temporaries + resident
    # target row) plus headroom, and stays well under physical VMEM.
    work_bytes = tl * per_col + 2 * 4 * L
    vmem_limit = int(min(limit_cap, max(32 * 2**20, work_bytes + (6 << 20))))

    kernel = functools.partial(_loss_kernel, threshold=threshold, sigma=sigma, tl=tl)

    ce_part, gst_part = pl.pallas_call(
        kernel,
        out_shape=(jax.ShapeDtypeStruct((N, 1, 128), jnp.float32),
                   jax.ShapeDtypeStruct((N, 1, 128), jnp.float32)),
        grid_spec=pltpu.PrefetchScalarGridSpec(
            num_scalar_prefetch=0,
            # NOTE: the prev_lp/prev_x carry scratch is only correct because the
            # L-tile axis is the innermost, sequential ("arbitrary") grid axis.
            # Do not reorder the grid or mark the L axis "parallel".
            grid=(N, num_lt),
            in_specs=[
                pl.BlockSpec((1, C, tl), lambda n, l: (n, 0, l)),
                pl.BlockSpec((1, 1, L), lambda n, l: (n, 0, 0)),   # resident target row
                pl.BlockSpec((1, D, tl), lambda n, l: (n, 0, l)),
            ],
            out_specs=(pl.BlockSpec((1, 1, 128), lambda n, l: (n, 0, 0)),
                       pl.BlockSpec((1, 1, 128), lambda n, l: (n, 0, 0))),
            scratch_shapes=[pltpu.VMEM((C, 1), jnp.float32),   # carried logp column
                            pltpu.VMEM((D, 1), jnp.float32)],  # carried feature column
        ),
        compiler_params=pltpu.CompilerParams(
            dimension_semantics=("parallel", "arbitrary"),
            vmem_limit_bytes=vmem_limit),
    )(inp, tgt, xs)

    ce = jnp.sum(ce_part[:, 0, 0]) / (N * L)                   # CE mean
    if L < 2:
        # TODO(synk): torch returns NaN here (mean over an empty tensor); guarded.
        return ce
    gst = jnp.sum(gst_part[:, 0, 0]) / (N * C * (L - 1))       # mean(sim * mse)
    return ce + gstmse_weight * gst


def _reference(inp, target, x, *, gstmse_weight=0.15, threshold=4, sigma=1.0):
    # Pure-JAX reference mirroring the PyTorch forward.
    logp = jax.nn.log_softmax(inp, axis=1)
    ce = -jnp.mean(jnp.take_along_axis(logp, target[:, None, :], axis=1))
    mse = jnp.clip((logp[:, :, 1:] - logp[:, :, :-1]) ** 2, 0.0, threshold ** 2)
    xs = jnp.squeeze(x, axis=1)
    diff = xs[:, :, 1:] - xs[:, :, :-1]
    sim = jnp.exp(-jnp.linalg.norm(diff, axis=1) / (2 * sigma ** 2))[:, None, :]
    return ce + gstmse_weight * jnp.mean(sim * mse)


if __name__ == "__main__":
    key = jax.random.PRNGKey(0)
    k1, k2, k3 = jax.random.split(key, 3)
    N, C, L, D = 2, 4, 256, 8
    inp = jax.random.normal(k1, (N, C, L), dtype=jnp.float32)
    target = jax.random.randint(k2, (N, L), 0, C, dtype=jnp.int32)
    x = jax.random.normal(k3, (N, 1, D, L), dtype=jnp.float32)

    ref = _reference(inp, target, x)

    # tl=128 -> two L-tiles per batch element: exercises the lane-tiled path,
    # the XLU-roll temporal diff + wrap mask, and the cross-tile boundary carry.
    out_tiled = jax.block_until_ready(
        cross_entropy_gstmse_loss(inp, target, x, tl=128))
    assert jnp.allclose(out_tiled, ref, rtol=1e-4, atol=1e-4), (out_tiled, ref)

    # default (generation-aware) tile chooser: single whole-L tile here.
    out_auto = jax.block_until_ready(cross_entropy_gstmse_loss(inp, target, x))
    assert jnp.allclose(out_auto, ref, rtol=1e-4, atol=1e-4), (out_auto, ref)

    print("KERNEL_OK")
</pallas_src>

<mosaic_0001>
module attributes {stable_mosaic.version = 11 : i64} {
  func.func @_loss_kernel(%arg0: i32, %arg1: i32, %arg2: memref<1x4x128xf32, #tpu.memory_space<vmem>>, %arg3: memref<1x1x256xi32, #tpu.memory_space<vmem>>, %arg4: memref<1x8x128xf32, #tpu.memory_space<vmem>>, %arg5: memref<1x1x128xf32, #tpu.memory_space<vmem>>, %arg6: memref<1x1x128xf32, #tpu.memory_space<vmem>>, %arg7: memref<4x1xf32, #tpu.memory_space<vmem>>, %arg8: memref<8x1xf32, #tpu.memory_space<vmem>>) attributes {dimension_semantics = [#tpu.dimension_semantics<parallel>, #tpu.dimension_semantics<arbitrary>], iteration_bounds = array<i64: 2, 2>, scalar_prefetch = 0 : i64, scratch_operands = 2 : i64, tpu.core_type = #tpu.core_type<tc>, window_params = [{transform_indices = @transform_0, window_bounds = array<i64: 1, 4, 128>}, {transform_indices = @transform_1, window_bounds = array<i64: 1, 1, 256>}, {transform_indices = @transform_2, window_bounds = array<i64: 1, 8, 128>}, {transform_indices = @transform_3, window_bounds = array<i64: 1, 1, 128>}, {transform_indices = @transform_4, window_bounds = array<i64: 1, 1, 128>}]} {
    %c0 = arith.constant 0 : index
    %c0_0 = arith.constant 0 : index
    %c0_1 = arith.constant 0 : index
    %0 = vector.load %arg2[%c0, %c0_0, %c0_1] : memref<1x4x128xf32, #tpu.memory_space<vmem>>, vector<1x4x128xf32>
    %1 = vector.shape_cast %0 : vector<1x4x128xf32> to vector<4x128xf32>
    %c0_2 = arith.constant 0 : index
    %c0_3 = arith.constant 0 : index
    %c0_4 = arith.constant 0 : index
    %2 = vector.load %arg4[%c0_2, %c0_3, %c0_4] : memref<1x8x128xf32, #tpu.memory_space<vmem>>, vector<1x8x128xf32>
    %3 = vector.shape_cast %2 : vector<1x8x128xf32> to vector<8x128xf32>
    %c128_i32 = arith.constant 128 : i32
    %4 = arith.muli %arg1, %c128_i32 : i32
    %5 = tpu.assume_multiple %4, 128 : i32
    %c0_5 = arith.constant 0 : index
    %c0_6 = arith.constant 0 : index
    %6 = arith.index_cast %5 : i32 to index
    %7 = vector.load %arg3[%c0_5, %c0_6, %6] : memref<1x1x256xi32, #tpu.memory_space<vmem>>, vector<1x1x128xi32>
    %8 = vector.shape_cast %7 : vector<1x1x128xi32> to vector<1x128xi32>
    %cst = arith.constant dense<0xFF800000> : vector<128xf32>
    %9 = vector.multi_reduction <maximumf>, %1, %cst [0] : vector<4x128xf32> to vector<128xf32>
    %10 = vector.shape_cast %9 : vector<128xf32> to vector<1x128xf32>
    %11 = vector.broadcast %10 : vector<1x128xf32> to vector<4x128xf32>
    %12 = arith.subf %1, %11 : vector<4x128xf32>
    %13 = math.exp %12 : vector<4x128xf32>
    %cst_7 = arith.constant dense<0.000000e+00> : vector<128xf32>
    %14 = vector.multi_reduction <add>, %13, %cst_7 [0] : vector<4x128xf32> to vector<128xf32>
    %15 = vector.shape_cast %14 : vector<128xf32> to vector<1x128xf32>
    %16 = math.log %15 : vector<1x128xf32>
    %17 = vector.broadcast %16 : vector<1x128xf32> to vector<4x128xf32>
    %18 = arith.subf %12, %17 : vector<4x128xf32>
    %19 = tpu.iota {dimensions = array<i32: 0>} : vector<4x128xi32>
    %20 = vector.broadcast %8 : vector<1x128xi32> to vector<4x128xi32>
    %21 = arith.cmpi eq, %19, %20 : vector<4x128xi32>
    %cst_8 = arith.constant 0.000000e+00 : f32
    %22 = vector.broadcast %cst_8 : f32 to vector<4x128xf32>
    %23 = arith.select %21, %18, %22 : vector<4x128xi1>, vector<4x128xf32>
    %24 = vector.shape_cast %23 : vector<4x128xf32> to vector<1x4x128xf32>
    %cst_9 = arith.constant dense<0.000000e+00> : vector<1xf32>
    %25 = vector.multi_reduction <add>, %24, %cst_9 [1, 2] : vector<1x4x128xf32> to vector<1xf32>
    %26 = vector.shape_cast %25 : vector<1xf32> to vector<1x1x1xf32>
    %27 = vector.extract %26[0, 0, 0] : f32 from vector<1x1x1xf32>
    %cst_10 = arith.constant 0.000000e+00 : f32
    %28 = arith.subf %cst_10, %27 : f32
    %c127_i32 = arith.constant 127 : i32
    %29 = tpu.dynamic_rotate %18 by %c127_i32 dim 1 : vector<4x128xf32>, i32 -> vector<4x128xf32>
    %30 = arith.subf %29, %18 : vector<4x128xf32>
    %31 = arith.mulf %30, %30 : vector<4x128xf32>
    %cst_11 = arith.constant 1.600000e+01 : f32
    %32 = vector.broadcast %cst_11 : f32 to vector<4x128xf32>
    %33 = arith.minimumf %31, %32 : vector<4x128xf32>
    %cst_12 = arith.constant dense<0.000000e+00> : vector<128xf32>
    %34 = vector.multi_reduction <add>, %33, %cst_12 [0] : vector<4x128xf32> to vector<128xf32>
    %35 = vector.shape_cast %34 : vector<128xf32> to vector<1x128xf32>
    %c127_i32_13 = arith.constant 127 : i32
    %36 = tpu.dynamic_rotate %3 by %c127_i32_13 dim 1 : vector<8x128xf32>, i32 -> vector<8x128xf32>
    %37 = arith.subf %36, %3 : vector<8x128xf32>
    %38 = arith.mulf %37, %37 : vector<8x128xf32>
    %cst_14 = arith.constant dense<0.000000e+00> : vector<128xf32>
    %39 = vector.multi_reduction <add>, %38, %cst_14 [0] : vector<8x128xf32> to vector<128xf32>
    %40 = vector.shape_cast %39 : vector<128xf32> to vector<1x128xf32>
    %41 = math.sqrt %40 : vector<1x128xf32>
    %cst_15 = arith.constant 0.000000e+00 : f32
    %42 = vector.broadcast %cst_15 : f32 to vector<1x128xf32>
    %43 = arith.subf %42, %41 : vector<1x128xf32>
    %cst_16 = arith.constant 5.000000e-01 : f32
    %44 = vector.broadcast %cst_16 : f32 to vector<1x128xf32>
    %45 = arith.mulf %43, %44 : vector<1x128xf32>
    %46 = math.exp %45 : vector<1x128xf32>
    %47 = tpu.iota {dimensions = array<i32: 1>} : vector<1x128xi32>
    %c127_i32_17 = arith.constant 127 : i32
    %48 = vector.broadcast %c127_i32_17 : i32 to vector<1x128xi32>
    %49 = arith.cmpi slt, %47, %48 : vector<1x128xi32>
    %50 = arith.mulf %46, %35 : vector<1x128xf32>
    %cst_18 = arith.constant 0.000000e+00 : f32
    %51 = vector.broadcast %cst_18 : f32 to vector<1x128xf32>
    %52 = arith.select %49, %50, %51 : vector<1x128xi1>, vector<1x128xf32>
    %53 = vector.shape_cast %52 : vector<1x128xf32> to vector<1x1x128xf32>
    %cst_19 = arith.constant dense<0.000000e+00> : vector<1xf32>
    %54 = vector.multi_reduction <add>, %53, %cst_19 [1, 2] : vector<1x1x128xf32> to vector<1xf32>
    %55 = vector.shape_cast %54 : vector<1xf32> to vector<1x1x1xf32>
    %56 = vector.extract %55[0, 0, 0] : f32 from vector<1x1x1xf32>
    %c0_i32 = arith.constant 0 : i32
    %57 = arith.cmpi eq, %arg1, %c0_i32 : i32
    %58 = arith.extui %57 : i1 to i32
    %c0_i32_20 = arith.constant 0 : i32
    %59 = arith.cmpi ne, %58, %c0_i32_20 : i32
    scf.if %59 {
      %cst_39 = arith.constant 0.000000e+00 : f32
      %75 = vector.broadcast %cst_39 : f32 to vector<1x1x128xf32>
      %c0_40 = arith.constant 0 : index
      %c0_41 = arith.constant 0 : index
      %c0_42 = arith.constant 0 : index
      %76 = vector.load %arg5[%c0_40, %c0_41, %c0_42] : memref<1x1x128xf32, #tpu.memory_space<vmem>>, vector<1x1x128xf32>
      tpu.vector_store %arg5[%c0_40, %c0_41, %c0_42], %75 {strides = array<i32>} : memref<1x1x128xf32, #tpu.memory_space<vmem>>, vector<1x1x128xf32>,
      %cst_43 = arith.constant 0.000000e+00 : f32
      %77 = vector.broadcast %cst_43 : f32 to vector<1x1x128xf32>
      %c0_44 = arith.constant 0 : index
      %c0_45 = arith.constant 0 : index
      %c0_46 = arith.constant 0 : index
      %78 = vector.load %arg6[%c0_44, %c0_45, %c0_46] : memref<1x1x128xf32, #tpu.memory_space<vmem>>, vector<1x1x128xf32>
      tpu.vector_store %arg6[%c0_44, %c0_45, %c0_46], %77 {strides = array<i32>} : memref<1x1x128xf32, #tpu.memory_space<vmem>>, vector<1x1x128xf32>,
    } else {
    }
    %c0_21 = arith.constant 0 : index
    %c0_22 = arith.constant 0 : index
    %c0_23 = arith.constant 0 : index
    %60 = vector.load %arg5[%c0_21, %c0_22, %c0_23] : memref<1x1x128xf32, #tpu.memory_space<vmem>>, vector<1x1x128xf32>
    %61 = vector.broadcast %28 : f32 to vector<1x1x128xf32>
    %62 = arith.addf %60, %61 : vector<1x1x128xf32>
    %c0_24 = arith.constant 0 : index
    %c0_25 = arith.constant 0 : index
    %c0_26 = arith.constant 0 : index
    %63 = vector.load %arg5[%c0_24, %c0_25, %c0_26] : memref<1x1x128xf32, #tpu.memory_space<vmem>>, vector<1x1x128xf32>
    tpu.vector_store %arg5[%c0_24, %c0_25, %c0_26], %62 {strides = array<i32>} : memref<1x1x128xf32, #tpu.memory_space<vmem>>, vector<1x1x128xf32>,
    %c0_27 = arith.constant 0 : index
    %c0_28 = arith.constant 0 : index
    %c0_29 = arith.constant 0 : index
    %64 = vector.load %arg6[%c0_27, %c0_28, %c0_29] : memref<1x1x128xf32, #tpu.memory_space<vmem>>, vector<1x1x128xf32>
    %65 = vector.broadcast %56 : f32 to vector<1x1x128xf32>
    %66 = arith.addf %64, %65 : vector<1x1x128xf32>
    %c0_30 = arith.constant 0 : index
    %c0_31 = arith.constant 0 : index
    %c0_32 = arith.constant 0 : index
    %67 = vector.load %arg6[%c0_30, %c0_31, %c0_32] : memref<1x1x128xf32, #tpu.memory_space<vmem>>, vector<1x1x128xf32>
    tpu.vector_store %arg6[%c0_30, %c0_31, %c0_32], %66 {strides = array<i32>} : memref<1x1x128xf32, #tpu.memory_space<vmem>>, vector<1x1x128xf32>,
    %c0_i32_33 = arith.constant 0 : i32
    %68 = arith.cmpi sgt, %arg1, %c0_i32_33 : i32
    %69 = arith.extui %68 : i1 to i32
    %c0_i32_34 = arith.constant 0 : i32
    %70 = arith.cmpi ne, %69, %c0_i32_34 : i32
    scf.if %70 {
      %75 = vector.extract_strided_slice %18 {offsets = [0, 0], sizes = [4, 1], strides = [1, 1]} : vector<4x128xf32> to vector<4x1xf32>
      %c0_39 = arith.constant 0 : index
      %c0_40 = arith.constant 0 : index
      %76 = vector.load %arg7[%c0_39, %c0_40] : memref<4x1xf32, #tpu.memory_space<vmem>>, vector<4x1xf32>
      %77 = arith.subf %75, %76 : vector<4x1xf32>
      %78 = arith.mulf %77, %77 : vector<4x1xf32>
      %cst_41 = arith.constant 1.600000e+01 : f32
      %79 = vector.broadcast %cst_41 : f32 to vector<4x1xf32>
      %80 = arith.minimumf %78, %79 : vector<4x1xf32>
      %81 = vector.shape_cast %80 : vector<4x1xf32> to vector<1x4x1xf32>
      %cst_42 = arith.constant dense<0.000000e+00> : vector<1xf32>
      %82 = vector.multi_reduction <add>, %81, %cst_42 [1, 2] : vector<1x4x1xf32> to vector<1xf32>
      %83 = vector.shape_cast %82 : vector<1xf32> to vector<1x1x1xf32>
      %84 = vector.extract %83[0, 0, 0] : f32 from vector<1x1x1xf32>
      %85 = vector.extract_strided_slice %3 {offsets = [0, 0], sizes = [8, 1], strides = [1, 1]} : vector<8x128xf32> to vector<8x1xf32>
      %c0_43 = arith.constant 0 : index
      %c0_44 = arith.constant 0 : index
      %86 = vector.load %arg8[%c0_43, %c0_44] : memref<8x1xf32, #tpu.memory_space<vmem>>, vector<8x1xf32>
      %87 = arith.subf %85, %86 : vector<8x1xf32>
      %88 = arith.mulf %87, %87 : vector<8x1xf32>
      %89 = vector.shape_cast %88 : vector<8x1xf32> to vector<1x8x1xf32>
      %cst_45 = arith.constant dense<0.000000e+00> : vector<1xf32>
      %90 = vector.multi_reduction <add>, %89, %cst_45 [1, 2] : vector<1x8x1xf32> to vector<1xf32>
      %91 = vector.shape_cast %90 : vector<1xf32> to vector<1x1x1xf32>
      %92 = vector.extract %91[0, 0, 0] : f32 from vector<1x1x1xf32>
      %93 = math.sqrt %92 : f32
      %c0_46 = arith.constant 0 : index
      %c0_47 = arith.constant 0 : index
      %c0_48 = arith.constant 0 : index
      %94 = vector.load %arg6[%c0_46, %c0_47, %c0_48] : memref<1x1x128xf32, #tpu.memory_space<vmem>>, vector<1x1x128xf32>
      %cst_49 = arith.constant 0.000000e+00 : f32
      %95 = arith.subf %cst_49, %93 : f32
      %cst_50 = arith.constant 5.000000e-01 : f32
      %96 = arith.mulf %95, %cst_50 : f32
      %97 = math.exp %96 : f32
      %98 = arith.mulf %97, %84 : f32
      %99 = vector.broadcast %98 : f32 to vector<1x1x128xf32>
      %100 = arith.addf %94, %99 : vector<1x1x128xf32>
      %c0_51 = arith.constant 0 : index
      %c0_52 = arith.constant 0 : index
      %c0_53 = arith.constant 0 : index
      %101 = vector.load %arg6[%c0_51, %c0_52, %c0_53] : memref<1x1x128xf32, #tpu.memory_space<vmem>>, vector<1x1x128xf32>
      tpu.vector_store %arg6[%c0_51, %c0_52, %c0_53], %100 {strides = array<i32>} : memref<1x1x128xf32, #tpu.memory_space<vmem>>, vector<1x1x128xf32>,
    } else {
    }
    %71 = vector.extract_strided_slice %18 {offsets = [0, 127], sizes = [4, 1], strides = [1, 1]} : vector<4x128xf32> to vector<4x1xf32>
    %c0_35 = arith.constant 0 : index
    %c0_36 = arith.constant 0 : index
    %72 = vector.load %arg7[%c0_35, %c0_36] : memref<4x1xf32, #tpu.memory_space<vmem>>, vector<4x1xf32>
    tpu.vector_store %arg7[%c0_35, %c0_36], %71 {strides = array<i32>} : memref<4x1xf32, #tpu.memory_space<vmem>>, vector<4x1xf32>,
    %73 = vector.extract_strided_slice %3 {offsets = [0, 127], sizes = [8, 1], strides = [1, 1]} : vector<8x128xf32> to vector<8x1xf32>
    %c0_37 = arith.constant 0 : index
    %c0_38 = arith.constant 0 : index
    %74 = vector.load %arg8[%c0_37, %c0_38] : memref<8x1xf32, #tpu.memory_space<vmem>>, vector<8x1xf32>
    tpu.vector_store %arg8[%c0_37, %c0_38], %73 {strides = array<i32>} : memref<8x1xf32, #tpu.memory_space<vmem>>, vector<8x1xf32>,
    return
  }
  func.func @transform_0(%arg0: i32, %arg1: i32) -> (i32, i32, i32) {
    %c0_i32 = arith.constant 0 : i32
    %c0_i32_0 = arith.constant 0 : i32
    return %arg0, %c0_i32, %arg1 : i32, i32, i32
  }
  func.func @transform_1(%arg0: i32, %arg1: i32) -> (i32, i32, i32) {
    %c0_i32 = arith.constant 0 : i32
    %c0_i32_0 = arith.constant 0 : i32
    %c0_i32_1 = arith.constant 0 : i32
    return %arg0, %c0_i32, %c0_i32_0 : i32, i32, i32
  }
  func.func @transform_2(%arg0: i32, %arg1: i32) -> (i32, i32, i32) {
    %c0_i32 = arith.constant 0 : i32
    %c0_i32_0 = arith.constant 0 : i32
    return %arg0, %c0_i32, %arg1 : i32, i32, i32
  }
  func.func @transform_3(%arg0: i32, %arg1: i32) -> (i32, i32, i32) {
    %c0_i32 = arith.constant 0 : i32
    %c0_i32_0 = arith.constant 0 : i32
    %c0_i32_1 = arith.constant 0 : i32
    return %arg0, %c0_i32, %c0_i32_0 : i32, i32, i32
  }
  func.func @transform_4(%arg0: i32, %arg1: i32) -> (i32, i32, i32) {
    %c0_i32 = arith.constant 0 : i32
    %c0_i32_0 = arith.constant 0 : i32
    %c0_i32_1 = arith.constant 0 : i32
    return %arg0, %c0_i32, %c0_i32_0 : i32, i32, i32
  }
}

</mosaic_0001>

<bundles_post_ra>
// kernel: tpu_custom_call.1
= control target key start
LH: loop header
LB: loop body
LE: loop exit
PB: predicated region body
PF: predicated region fallthrough
CT: control target
= control target key end

     0   :  { %s1543_s0 = inlined_call_operand.hbm [shape: f32[2,4,256], index: 0, kind: input, shape index: {}]   ;;  %s1544_s1 = inlined_call_operand.hbm [shape: s32[2,1,256], index: 1, kind: input, shape index: {}]   ;;  %s1545_s2 = inlined_call_operand.hbm [shape: f32[2,8,256], index: 2, kind: input, shape index: {}]   ;;  %s1546_s3 = inlined_call_operand.hbm [shape: f32[2,1,128], index: 3, kind: output, shape index: {0}]   ;;  %s1547_s4 = inlined_call_operand.hbm [shape: f32[2,1,128], index: 4, kind: output, shape index: {1}]  }
   0x1   :  { %1564 = sst [smem:[#allocation25_spill]] %s1544_s1 }
   0x2   :  { %1565 = sst [smem:[#allocation26_spill]] %s1546_s3 }
   0x3   :  { %1566 = sst [smem:[#allocation27_spill]] %s1547_s4 }
   0x4   :  { %10 = vsyncpa [#allocation5], 0 }
   0x5   :  { %12 = vsyncpa [#allocation5 + $0x1], 0 }
   0x6   :  { %13 = vsyncpa [#allocation8], 0 }
   0x7   :  { %15 = vsyncpa [#allocation8 + $0x1], 0 }
   0x8   :  { %16 = vsyncpa [#allocation6], 0 }
   0x9   :  { %18 = vsyncpa [#allocation6 + $0x1], 0 }
   0xa   :  { %19 = vsyncpa [#allocation12], 0 }
   0xb   :  { %21 = vsyncpa [#allocation12 + $0x1], 0  ;;  %s1129_s15 = smov 0   ;;  %s1131_s16 = smov 0  }
   0xc   :  { %s1133_s17 = smov 0   ;;  %s1135_s18 = smov 0  }
   0xd   :  { %s1137_s19 = smov 0   ;;  %s1139_s20 = smov 0  }
   0xe   :  { %s1141_s21 = smov 0   ;;  %s1143_s22 = smov 0  }
   0xf   :  { %s1145_s23 = smov 0   ;;  %s1147_s24 = smov 0  }
  0x10   :  { %s1149_s25 = smov 0  }
  0x11 LB: > { %1567 = sst [smem:[#allocation18_spill]] %s1054_s15  ;;  %s1185_s26 = sadd.s32 4294967295, %s1094_s25   ;;  %s1094_s25 = sphi %s1149_s25, %s27_s25   ;;  %s1090_s24 = sphi %s1147_s24, %s1616_s24   ;;  %s1086_s23 = sphi %s1145_s23, %s1615_s23   ;;  %s1082_s22 = sphi %s1143_s22, %s1614_s22   ;;  %s1078_s21 = sphi %s1141_s21, %s1613_s21   ;;  %s1074_s20 = sphi %s1139_s20, %s1612_s20   ;;  %s1070_s19 = sphi %s1137_s19, %s1611_s19   ;;  %s1066_s18 = sphi %s1135_s18, %s1610_s18   ;;  %s1062_s17 = sphi %s1133_s17, %s1609_s17   ;;  %s1058_s16 = sphi %s1131_s16, %s1608_s16   ;;  %s1054_s15 = sphi %s1129_s15, %s1607_s15  }
  0x12   : > { %1568 = sst [smem:[#allocation19_spill]] %s1078_s21  ;;  %s673_s27 = sadd.s32 4294967294, %s1094_s25  }
  0x13   : > { %1569 = sst [smem:[#allocation20_spill]] %s1082_s22  ;;  %p1550_p0 = scmp.eq.s32.totalorder %s1094_s25, 0 }
  0x14   : > { %p1549_p1 = scmp.eq.s32.totalorder %s1185_s26, 0  ;;  %p81_p2 = scmp.ne.s32.totalorder %s1062_s17, %s1058_s16 }
  0x15   : > { %p87_p3 = scmp.ne.s32.totalorder %s1058_s16, %s1054_s15  ;;  %p139_p4 = scmp.eq.s32.totalorder %s1185_s26, 3 }
  0x16   : > { %p145_p5 = scmp.eq.s32.totalorder %s673_s27, 3  ;;  %p1199_p6 = por %p81_p2, %p1550_p0 }
  0x17   : > { %p1205_p7 = por %p87_p3, %p1549_p1  ;;  %p1209_p8 = por %p139_p4, %p81_p2 }
  0x18   : > { %p1213_p9 = por %p145_p5, %p87_p3  ;;  %p1548_p10 = scmp.lt.s32.totalorder %s1094_s25, 4 }
  0x19   : > { %s1571_s5 = scalar_select %p1205_p7, 1, 0 }
  0x1a   : > { %s1572_s6 = scalar_select %p1209_p8, 1, 0 }
  0x1b   : > { %s1574_s7 = scalar_select %p1213_p9, 1, 0 }
  0x1c   : > { %1573 = sst [smem:[#allocation21_spill]] %s1572_s6  ;;  %s211_s8 = sand.u32 1, %s1094_s25  }
  0x1d   : > { %1575 = sst [smem:[#allocation22_spill]] %s1574_s7  ;;  %s213_s9 = sand.u32 1, %s1062_s17  }
  0x1e   : > { %s679_s10 = sshll.u32 %s213_s9, 1  ;;  %s697_s11 = sshll.u32 %s1090_s24, 5 }
  0x1f   : > { %s1576_s1 = sld [smem:[#allocation25_spill]]  ;;  %s215_s27 = scalar_lea.vmem [#allocation7], %s679_s10 }
  0x20   : > { %s223_s29 = sshll.u32 %s215_s27, 4  ;;  %p1232_p11 = pnand %p1548_p10, %p1199_p6  ;;  %s1226_s29 = int_to_ptr.vmem [resolvable:$true] %s223_s29 }
  0x21   : > { %s1238_s9 = scalar_lea.sflag [#allocation8], %s211_s8 }
  0x22   : > { %p844_p3 = pneg %p1232_p11 }
  0x25   : > { %s1224_s14 = scalar_lea.hbm %s1576_s1, %s697_s11  ;;  %s847_s12 = scalar_lea.hbm %s1576_s1, 64 }
  0x26   : > { %s842_s11 = scalar_lea.hbm %s1224_s14, 32  ;;  %p848_p6 = scmp.lt.u32.totalorder %s1224_s14, %s1576_s1 }
  0x27   : > { %p843_p2 = scmp.ne.s32.totalorder %s1224_s14, %s842_s11  ;;  %p849_p10 = scmp.lt.u32.totalorder %s847_s12, %s842_s11 }
  0x28   : > { %p851_p0 = scmp.lt.u32.totalorder %s842_s11, %s1224_s14 }
  0x29   : > { %p845_p4 = pnand %p844_p3, %p843_p2  ;;  %p850_p1 = por %p849_p10, %p848_p6 }
  0x2b   : > { %p846_p5 = pneg %p845_p4  ;;  %p852_p12 = por %p851_p0, %p850_p1 }
  0x2d   : > { %p853_p13 = pnand %p852_p12, %p846_p5 }
  0x2f   : > { %856 = shalt.err (!%p853_p13)
}
  0x30   : > { %s857_s8 = scalar_lea.vmem %s1226_s29, 32  ;;  %s1096_s30 = smov [#allocation7]  }
  0x31   : > { %p858_p2 = scmp.ne.s32.totalorder %s1226_s29, %s857_s8  ;;  %s862_s10 = sshll.u32 %s1096_s30, 4  ;;  %s863_s10 = int_to_ptr.vmem [resolvable:$false] %s862_s10 }
  0x32   : > { %s864_s13 = scalar_lea.vmem %s863_s10, 64  ;;  %p865_p8 = scmp.lt.s32.totalorder %s1226_s29, %s863_s10 }
  0x33   : > { %p860_p4 = pnand %p858_p2, %p844_p3  ;;  %p866_p10 = scmp.lt.s32.totalorder %s864_s13, %s857_s8 }
  0x35   : > { %p861_p9 = pneg %p860_p4  ;;  %p867_p6 = por %p866_p10, %p865_p8 }
  0x37   : > { %p868_p0 = pnand %p867_p6, %p861_p9 }
  0x39   : > { %871 = shalt.err (!%p868_p0)
}
  0x3a   : > { %726 = dma.hbm_to_vmem [thread:$0]  (!%p1232_p11), %s1224_s14, 32, %s1226_s29, %s1238_s9  }
  0x3b   : > { %p1578_p1 = scmp.lt.s32.totalorder %s1094_s25, 5  ;;  %p1579_p8 = scmp.ge.s32.totalorder %s1094_s25, 1 }
  0x3c   : > { %s36_s11 = sadd.s32 1, %s1086_s23  ;;  %s48_s12 = sadd.s32 1, %s1074_s20 }
  0x3d   : > { %p1270_p9 = pnand %p1579_p8, %p1578_p1  ;;  %p37_p12 = scmp.ge.s32.totalorder %s36_s11, 2 }
  0x3e   : > { %p55_p13 = scmp.ne.s32.totalorder %s1074_s20, %s1070_s19  ;;  %p61_p3 = scmp.ne.s32.totalorder %s1070_s19, %s1066_s18 }
  0x3f   : > { %s1580_s28 = scalar_select %p1270_p9, 1, 0 }
  0x40   : > { %s1281_s27 = sand.u32 1, %s1074_s20   ;;  %s1618_s11 = smov (%p37_p12, %s36_s11), 0 }
  0x41   : > { %1581 = sst [smem:[#allocation23_spill]] %s1618_s11  ;;  %s1582_s29 = sadd.s32 1, %s1090_s24 }
  0x42   : > { %s1620_s29 = smov (!%p37_p12, %s1582_s29), %s1090_s24  ;;  %s44_s14 = ssub.s32 %s1086_s23, %s1618_s11 }
  0x43   : > { %p1583_p11 = scmp.eq.s32.totalorder %s1094_s25, 0  ;;  %p41_p2 = scmp.ge.s32.totalorder %s1620_s29, 2 }
  0x44   : > { %p1585_p4 = scmp.eq.s32.totalorder %s1185_s26, 0  ;;  %s676_s30 = sshll.u32 %s1281_s27, 2 }
  0x45   : > { %p1292_p5 = por %p1583_p11, %p55_p13  ;;  %s1622_s29 = smov (%p41_p2, %s1620_s29), 0 }
  0x46   : > { %p1298_p10 = por %p1585_p4, %p61_p3  ;;  %1587 = sst [smem:[#allocation24_spill]] %s1622_s29 }
  0x47   : > { %s677_s10 = sshll.u32 %s1090_s24, 1  ;;  %s43_s13 = ssub.s32 %s1090_s24, %s1622_s29 }
  0x48   : > { %s1586_s18 = scalar_select %p1298_p10, 1, 0 }
  0x49   : > { %s1309_s1 = sadd.s32 %s1086_s23, %s677_s10  ;;  %s45_s11 = sor.u32 %s44_s14, %s43_s13 }
  0x4a   : > { %p72_p6 = scmp.eq.s32.totalorder %s43_s13, 0  ;;  %p46_p0 = scmp.eq.s32.totalorder %s45_s11, 0 }
  0x4b   : > { %s678_s7 = sshll.u32 %s1309_s1, 6  ;;  %s1588_s15 = sadd.s32 1, %s1062_s17 }
  0x4c   : > { %s1315_s4 = scalar_select %p72_p6, %s1062_s17, %s1588_s15  }
  0x4d   : > { %s1318_s3 = scalar_select %p46_p0, %s1074_s20, %s48_s12  }
  0x4e   : > { %s1323_s21 = scalar_lea.hbm %s1543_s0, %s678_s7  ;;  %s195_s10 = scalar_lea.vmem [#allocation4], %s676_s30 }
  0x4f   : > { %s204_s29 = sshll.u32 %s195_s10, 4  ;;  %p1589_p1 = scmp.lt.s32.totalorder %s1094_s25, 4  ;;  %s1325_s29 = int_to_ptr.vmem [resolvable:$true] %s204_s29 }
  0x50   : > { %s684_s11 = sshll.u32 %s1309_s1, 7  ;;  %s682_s22 = sshll.u32 %s1281_s27, 3 }
  0x51   : > { %p1331_p8 = pnand %p1589_p1, %p1292_p5  ;;  %s192_s6 = scalar_lea.sflag [#allocation5], %s1281_s27 }
  0x52   : > { %s872_s7 = scalar_lea.hbm %s1323_s21, 64  ;;  %s877_s8 = scalar_lea.hbm %s1543_s0, 256 }
  0x53   : > { %p873_p12 = scmp.ne.s32.totalorder %s1323_s21, %s872_s7  ;;  %p874_p13 = pneg %p1331_p8 }
  0x54   : > { %p878_p5 = scmp.lt.u32.totalorder %s1323_s21, %s1543_s0  ;;  %p879_p2 = scmp.lt.u32.totalorder %s877_s8, %s872_s7 }
  0x55   : > { %p875_p3 = pnand %p874_p13, %p873_p12  ;;  %p881_p6 = scmp.lt.u32.totalorder %s872_s7, %s1323_s21 }
  0x56   : > { %p880_p4 = por %p879_p2, %p878_p5 }
  0x57   : > { %p876_p11 = pneg %p875_p3 }
  0x58   : > { %p882_p0 = por %p881_p6, %p880_p4 }
  0x5a   : > { %p883_p1 = pnand %p882_p0, %p876_p11 }
  0x5c   : > { %886 = shalt.err (!%p883_p1)
}
  0x5d   : > { %s887_s10 = scalar_lea.vmem %s1325_s29, 64  ;;  %s1097_s12 = smov [#allocation4]  }
  0x5e   : > { %p888_p12 = scmp.ne.s32.totalorder %s1325_s29, %s887_s10  ;;  %s892_s14 = sshll.u32 %s1097_s12, 4  ;;  %s893_s14 = int_to_ptr.vmem [resolvable:$false] %s892_s14 }
  0x5f   : > { %s894_s30 = scalar_lea.vmem %s893_s14, 128  ;;  %p895_p10 = scmp.lt.s32.totalorder %s1325_s29, %s893_s14 }
  0x60   : > { %p890_p3 = pnand %p888_p12, %p874_p13  ;;  %p896_p5 = scmp.lt.s32.totalorder %s894_s30, %s887_s10 }
  0x62   : > { %p891_p7 = pneg %p890_p3  ;;  %p897_p2 = por %p896_p5, %p895_p10 }
  0x64   : > { %p898_p4 = pnand %p897_p2, %p891_p7 }
  0x66   : > { %901 = shalt.err (!%p898_p4)
}
  0x67   : > { %723 = dma.hbm_to_vmem [thread:$0]  (!%p1331_p8), %s1323_s21, 64, %s1325_s29, %s192_s6  }
  0x68   : > { %s1368_s13 = scalar_lea.hbm %s1545_s2, %s684_s11  ;;  %s234_s10 = scalar_lea.vmem [#allocation9], %s682_s22 }
  0x69   : > { %s243_s12 = sshll.u32 %s234_s10, 4  ;;  %s902_s14 = scalar_lea.hbm %s1368_s13, 128  ;;  %s244_s12 = int_to_ptr.vmem [resolvable:$true] %s243_s12 }
  0x6a   : > { %p903_p7 = scmp.ne.s32.totalorder %s1368_s13, %s902_s14  ;;  %s907_s29 = scalar_lea.hbm %s1545_s2, 512 }
  0x6b   : > { %p908_p6 = scmp.lt.u32.totalorder %s1368_s13, %s1545_s2  ;;  %p909_p0 = scmp.lt.u32.totalorder %s907_s29, %s902_s14 }
  0x6c   : > { %p905_p10 = pnand %p903_p7, %p874_p13  ;;  %p911_p12 = scmp.lt.u32.totalorder %s902_s14, %s1368_s13 }
  0x6d   : > { %p910_p1 = por %p909_p0, %p908_p6 }
  0x6e   : > { %p906_p11 = pneg %p905_p10 }
  0x6f   : > { %p912_p3 = por %p911_p12, %p910_p1 }
  0x71   : > { %p913_p5 = pnand %p912_p3, %p906_p11 }
  0x73   : > { %916 = shalt.err (!%p913_p5)
}
  0x74   : > { %s917_s27 = scalar_lea.vmem %s244_s12, 128  ;;  %s1098_s22 = smov [#allocation9]  }
  0x75   : > { %p918_p2 = scmp.ne.s32.totalorder %s244_s12, %s917_s27  ;;  %s922_s30 = sshll.u32 %s1098_s22, 4  ;;  %s923_s30 = int_to_ptr.vmem [resolvable:$false] %s922_s30 }
  0x76   : > { %s924_s7 = scalar_lea.vmem %s923_s30, 256  ;;  %p925_p10 = scmp.lt.s32.totalorder %s244_s12, %s923_s30 }
  0x77   : > { %p920_p4 = pnand %p918_p2, %p874_p13  ;;  %p926_p9 = scmp.lt.s32.totalorder %s924_s7, %s917_s27 }
  0x79   : > { %p921_p7 = pneg %p920_p4  ;;  %p927_p0 = por %p926_p9, %p925_p10 }
  0x7b   : > { %p928_p6 = pnand %p927_p0, %p921_p7 }
  0x7d   : > { %931 = shalt.err (!%p928_p6)
}
  0x7e   : > { %729 = dma.hbm_to_vmem [thread:$0]  (!%p1331_p8), %s1368_s13, 128, %s244_s12, %s1238_s9  }
  0x7f   : > { %p1591_p11 = scmp.ne.s32.totalorder %s1580_s28, 0 }
  0x80   : > { %s254_s8 = sand.u32 (!%p1591_p11), 1, %s1070_s19   ;;  %p1592_p13 = scmp.ne.s32.totalorder (!%p1591_p11), %s1586_s18, 0 }
  0x81   : > { %252 = sbr.rel (%p1591_p11) target bundleno = 1050 (0x41a), region = 32  ;;  %s686_s10 = sshll.u32 (!%p1591_p11), %s254_s8, 2 }
  0x82   : > { %s255_s14 = scalar_lea.sflag (!%p1591_p11), [#allocation5], %s254_s8  ;;  %s258_s1 = scalar_lea.vmem (!%p1591_p11), [#allocation4], %s686_s10 }
  0x88   : > { %1033 = dma.done.wait (%p1592_p13), %s255_s14, 64  }
  0x89   : > { %1035 = vsyncadd (%p1592_p13), %s255_s14, 4294967232  ;;  %s263_s15 = sand.u32 1, %s1185_s26   ;;  %s1401_s21 = sand.u32 1, %s1058_s16  }
  0x8a   : > { %s687_s9 = sshll.u32 %s1401_s21, 1  ;;  %s264_s28 = scalar_lea.sflag [#allocation8], %s263_s15 }
  0x8b   : > { %s1404_s13 = scalar_lea.vmem [#allocation7], %s687_s9  ;;  %p1593_p9 = scmp.ne.s32.totalorder %s1571_s5, 0 }
  0x8d   : > { %1037 = dma.done.wait (%p1593_p9), %s264_s28, 32  }
  0x8e   : > { %1039 = vsyncadd (%p1593_p9), %s264_s28, 4294967264  ;;  %s688_s12 = sshll.u32 %s254_s8, 3 }
  0x8f   : > { %s276_s29 = scalar_lea.vmem [#allocation9], %s688_s12 }
  0x90   : > { %1041 = dma.done.wait (%p1592_p13), %s264_s28, 128  }
  0x91   : > { %1043 = vsyncadd (%p1592_p13), %s264_s28, 4294967168  ;;  %vm321_vm0 = vcmask 1043456   ;;  %v1414_v0 = vld [vmem:[%s276_s29] sm:$0xff]  ;;  %v314_v1 = vld [vmem:[%s258_s1] sm:$0xf]  ;;  %s1099_s26 = smov 127   ;;  %v342_v19 = vlaneseq }
  0x92   : > { %373 = vrot.lane.b32.xlu0 %v1414_v0, %s1099_s26  ;;  %v322_v2 = vsel %vm321_vm0, %v314_v1, -inf  ;;  %s1594_s5 = sld [smem:[#allocation19_spill]]  ;;  %vm399_vm5 = vcmask 1040384   ;;  %s1432_s7 = scalar_lea.vmem [#allocation10], %s1401_s21 }
  0x93   : > { %v323_v3 = vrot.slane %v322_v2, 4  ;;  %v343_v21 = vshrl.u32 %v342_v19, 7  ;;  %v395_v53 = vand.u32 127, %v342_v19  ;;  %s1435_s8 = scalar_lea.vmem [#allocation11], %s1401_s21 }
  0x95   : > { %v324_v4 = vmax.f32 %v322_v2, %v323_v3  ;;  %vm396_vm4 = vcmp.lt.s32.totalorder %v395_v53, 127 }
  0x97   : > { %v325_v5 = vrot.slane %v324_v4, 2 }
  0x98   : > { %s689_s18 = sshll.u32 %s1594_s5, 7  ;;  %p691_p8 = scmp.ne.s32.totalorder %s1594_s5, 0 }
  0x99   : > { %v326_v6 = vmax.f32 %v324_v4, %v325_v5  ;;  %s317_s11 = sshra.s32 %s689_s18, 7 }
  0x9a   : > { %s319_s6 = scalar_lea.vmem %s1404_s13, %s317_s11 [#allocation7] }
  0x9b   : > { %v327_v7 = vrot.slane %v326_v6, 1  ;;  %v690_v23 = vld [vmem:[%s319_s6] ss:$0 sm:$0xff] }
  0x9c   : > { %vm348_vm1 = vcmp.eq.s32.totalorder %v343_v21, %v690_v23 }
  0x9d   : > { %v328_v8 = vmax.f32 %v326_v6, %v327_v7 }
  0x9f   : > { %v329_v9 = vsub.f32 %v314_v1, %v328_v8 }
  0xa1   : > { %v330_v10 = vmul.f32 1.442695, %v329_v9 }
  0xa3   : > { %830 = vpow2.f32 %v330_v10 }
  0xad   : > { %v831_v11 = vpop.eup %830 }
  0xae   : > { %v332_v12 = vsel %vm321_vm0, %v831_v11, 0.0  ;;  %v1100_v11 = vmov (!%p691_p8), 0.0  }
  0xaf   : > { %v333_v13 = vrot.slane %v332_v12, 4  ;;  %414 = vst [vmem:[%s1432_s7] sm:$0x1] (!%p691_p8), %v1100_v11  ;;  %415 = vst [vmem:[%s1435_s8] sm:$0x1] (!%p691_p8), %v1100_v11 }
  0xb1   : > { %v334_v14 = vadd.f32 %v333_v13, %v332_v12 }
  0xb3   : > { %v335_v15 = vrot.slane %v334_v14, 2 }
  0xb5   : > { %v336_v16 = vadd.f32 %v335_v15, %v334_v14 }
  0xb7   : > { %v337_v17 = vrot.slane %v336_v16, 1 }
  0xb9   : > { %v338_v18 = vadd.f32 %v337_v17, %v336_v16 }
  0xbb   : > { %832 = vlog2.f32 %v338_v18 }
  0xc5   : > { %v833_v20 = vpop.eup %832 }
  0xc6   : > { %v340_v22 = vmul.f32 0.6931472, %v833_v20 }
  0xc8   : > { %v1422_v24 = vsub.f32 %v329_v9, %v340_v22 }
  0xca   : > { %361 = vrot.lane.b32.xlu0 %v1422_v24, %s1099_s26  ;;  %v349_v25 = vsel %vm348_vm1, %v1422_v24, 0.0 }
  0xcb   : > { %v350_v26 = vsel %vm321_vm0, %v349_v25, 0.0 }
  0xcc   : > { %351 = vadd.xlane.f32.xlu1 %v350_v26 }
 0x104   : > { %v374_v27 = vpop.permute.xlu0 %373 }
 0x105   : > { %v375_v28 = vsub.f32 %v374_v27, %v1414_v0 }
 0x107   : > { %v376_v29 = vmul.f32 %v375_v28, %v375_v28 }
 0x109   : > { %v377_v30 = vrot.slane %v376_v29, 4 }
 0x10b   : > { %v378_v31 = vadd.f32 %v377_v30, %v376_v29 }
 0x10d   : > { %v379_v32 = vrot.slane %v378_v31, 2 }
 0x10f   : > { %v380_v33 = vadd.f32 %v379_v32, %v378_v31 }
 0x111   : > { %v381_v34 = vrot.slane %v380_v33, 1 }
 0x113   : > { %v382_v35 = vadd.f32 %v381_v34, %v380_v33 }
 0x115   : > { %834 = vrsqrt.f32 %v382_v35  ;;  %vm385_vm2 = vcmp.eq.f32.partialorder %v382_v35, inf  ;;  %v388_v38 = vand.u32 2147483648, %v382_v35  ;;  %vm387_vm3 = vcmp.eq.f32.partialorder %v382_v35, 0.0 }
 0x11f   : > { %v835_v36 = vpop.eup %834 }
 0x120   : > { %v384_v37 = vmul.f32 %v835_v36, %v382_v35 }
 0x122   : > { %v386_v39 = vsel %vm385_vm2, %v382_v35, %v384_v37 }
 0x123   : > { %v389_v40 = vsel %vm387_vm3, %v388_v38, %v386_v39 }
 0x124   : > { %v390_v41 = vsub.f32 0.0, %v389_v40 }
 0x126   : > { %v391_v44 = vmul.f32 0.5, %v390_v41 }
 0x128   : > { %v392_v47 = vmul.f32 1.442695, %v391_v44 }
 0x12a   : > { %836 = vpow2.f32 %v392_v47 }
 0x134   : > { %v837_v56 = vpop.eup %836 }
 0x13c   : > { %v362_v42 = vpop.permute.xlu0 %361 }
 0x13d   : > { %v363_v43 = vsub.f32 %v362_v42, %v1422_v24 }
 0x13f   : > { %v364_v45 = vmul.f32 %v363_v43, %v363_v43 }
 0x141   : > { %v365_v46 = vmin.f32 %v364_v45, 16.0 }
 0x143   : > { %v366_v48 = vsel %vm321_vm0, %v365_v46, 0.0 }
 0x144   : > { %v367_v49 = vrot.slane %v366_v48, 4 }
 0x146   : > { %v368_v50 = vadd.f32 %v367_v49, %v366_v48 }
 0x148   : > { %v369_v51 = vrot.slane %v368_v50, 2 }
 0x14a   : > { %v370_v52 = vadd.f32 %v369_v51, %v368_v50 }
 0x14c   : > { %v371_v54 = vrot.slane %v370_v52, 1 }
 0x14e   : > { %v372_v55 = vadd.f32 %v371_v54, %v370_v52 }
 0x150   : > { %v397_v57 = vmul.f32 %v837_v56, %v372_v55 }
 0x152   : > { %v398_v58 = vsel %vm396_vm4, %v397_v57, 0.0 }
 0x153   : > { %v400_v59 = vsel %vm399_vm5, %v398_v58, 0.0 }
 0x154   : > { %401 = vadd.xlane.f32.xlu1 %v400_v59 }
 0x159   : > { %v352_v60 = vpop.xlane.xlu1 %351 }
 0x15a   : > { %v353_v61 = vrot.slane %v352_v60, 4 }
 0x15c   : > { %v354_v62 = vadd.f32 %v353_v61, %v352_v60 }
 0x15e   : > { %v355_v63 = vrot.slane %v354_v62, 2 }
 0x160   : > { %v356_v1 = vadd.f32 %v355_v63, %v354_v62 }
 0x162   : > { %v357_v2 = vrot.slane %v356_v1, 1 }
 0x164   : > { %v358_v3 = vadd.f32 %v357_v2, %v356_v1 }
 0x166   : > { %698 = vpush %v358_v3 }
 0x197   : > { %s699_s27 = spop %698 }
 0x198   : > { %s360_s22 = ssub.f32 0.0, %s699_s27 }
 0x1e1   : > { %v402_v4 = vpop.xlane.xlu1 %401 }
 0x1e2   : > { %v403_v5 = vrot.slane %v402_v4, 4 }
 0x1e4   : > { %v404_v6 = vadd.f32 %v403_v5, %v402_v4 }
 0x1e6   : > { %v405_v7 = vrot.slane %v404_v6, 2 }
 0x1e8   : > { %v406_v8 = vadd.f32 %v405_v7, %v404_v6 }
 0x1ea   : > { %v407_v9 = vrot.slane %v406_v8, 1 }
 0x1ec   : > { %v408_v10 = vadd.f32 %v407_v9, %v406_v8 }
 0x1ee   : > { %700 = vpush %v408_v10 }
 0x219   : > { %413 = sbr.rel (%p691_p8) target bundleno = 544 (0x220), region = 48 }
 0x21f   : > { %s701_s30 = spop %700 }
 0x220 PF: > { %v416_v12 = vld [vmem:[%s1432_s7] sm:$0x1]  ;;  %v417_v13 = vstv %s360_s22  ;;  %v421_v15 = vstv %s701_s30  ;;  %s1595_s10 = sld [smem:[#allocation19_spill]] }
 0x221   : > { %v420_v14 = vld [vmem:[%s1435_s8] sm:$0x1]  ;;  %v418_v16 = vadd.f32 %v417_v13, %v416_v12 }
 0x222   : > { %v422_v17 = vadd.f32 %v421_v15, %v420_v14 }
 0x223   : > { %419 = vst [vmem:[%s1432_s7] sm:$0x1] %v418_v16 }
 0x224   : > { %423 = vst [vmem:[%s1435_s8] sm:$0x1] %v422_v17 }
 0x226   : > { %p692_p1 = scmp.le.s32.totalorder %s1595_s10, 0 }
 0x227   : > { %v428_v18 = vld [vmem:[#allocation2] sm:$0xf] (!%p692_p1)  ;;  %v443_v19 = vld [vmem:[#allocation3] sm:$0xff] (!%p692_p1)  ;;  %vm432_vm6 = vcmask (!%p692_p1), 3072   ;;  %vm446_vm7 = vcmask (!%p692_p1), 7168  }
 0x228   : > { %427 = sbr.rel (%p692_p1) target bundleno = 907 (0x38b), region = 52  ;;  %v429_v20 = vsub.f32 (!%p692_p1), %v1422_v24, %v428_v18  ;;  %v444_v21 = vsub.f32 (!%p692_p1), %v1414_v0, %v443_v19 }
 0x22a   : > { %v430_v22 = vmul.f32 (!%p692_p1), %v429_v20, %v429_v20  ;;  %v445_v25 = vmul.f32 (!%p692_p1), %v444_v21, %v444_v21 }
 0x22b   : > { %v466_v51 = vld [vmem:[%s1435_s8] sm:$0x1] (!%p692_p1) }
 0x22c   : > { %v431_v23 = vmin.f32 (!%p692_p1), %v430_v22, 16.0  ;;  %v447_v27 = vsel (!%p692_p1), %vm446_vm7, %v445_v25, 0.0 }
 0x22e   : > { %v433_v26 = vsel (!%p692_p1), %vm432_vm6, %v431_v23, 0.0 }
 0x22f   : > { %434 = vadd.xlane.f32.xlu0 %v433_v26 }
 0x233   : > { %448 = vadd.xlane.f32.xlu0 %v447_v27 }
 0x2bc   : > { %v435_v28 = vpop.xlane.xlu0 %434 }
 0x2bd   : > { %v436_v29 = vrot.slane %v435_v28, 4 }
 0x2bf   : > { %v437_v30 = vadd.f32 %v436_v29, %v435_v28 }
 0x2c0   : > { %v449_v31 = vpop.xlane.xlu0 %448 }
 0x2c1   : > { %v438_v32 = vrot.slane %v437_v30, 2  ;;  %v450_v33 = vrot.slane %v449_v31, 4 }
 0x2c3   : > { %v451_v34 = vadd.f32 %v450_v33, %v449_v31  ;;  %v439_v35 = vadd.f32 %v438_v32, %v437_v30 }
 0x2c5   : > { %v452_v36 = vrot.slane %v451_v34, 2  ;;  %v440_v37 = vrot.slane %v439_v35, 1 }
 0x2c7   : > { %v453_v38 = vadd.f32 %v452_v36, %v451_v34  ;;  %v441_v39 = vadd.f32 %v440_v37, %v439_v35 }
 0x2c9   : > { %702 = vpush %v441_v39  ;;  %v454_v40 = vrot.slane %v453_v38, 1 }
 0x2cb   : > { %v455_v41 = vadd.f32 %v454_v40, %v453_v38 }
 0x2cd   : > { %704 = vpush %v455_v41 }
 0x2fa   : > { %s703_s14 = spop %702 }
 0x2fe   : > { %s705_s1 = spop %704 }
 0x2ff   : > { %v457_v42 = vstv %s705_s1 }
 0x300   : > { %838 = vrsqrt.f32 %v457_v42  ;;  %vm460_vm8 = vcmp.eq.f32.partialorder %v457_v42, inf  ;;  %v463_v45 = vand.u32 2147483648, %v457_v42  ;;  %vm462_vm9 = vcmp.eq.f32.partialorder %v457_v42, 0.0 }
 0x30a   : > { %v839_v43 = vpop.eup %838 }
 0x30b   : > { %v459_v44 = vmul.f32 %v839_v43, %v457_v42 }
 0x30d   : > { %v461_v46 = vsel %vm460_vm8, %v457_v42, %v459_v44 }
 0x30e   : > { %v464_v47 = vsel %vm462_vm9, %v463_v45, %v461_v46 }
 0x30f   : > { %706 = vpush %v464_v47 }
 0x340   : > { %s707_s15 = spop %706 }
 0x341   : > { %s467_s9 = ssub.f32 0.0, %s707_s15 }
 0x343   : > { %s468_s28 = smul.f32 0.5, %s467_s9 }
 0x345   : > { %v469_v48 = vstv %s468_s28 }
 0x346   : > { %v470_v49 = vmul.f32 1.442695, %v469_v48 }
 0x348   : > { %840 = vpow2.f32 %v470_v49 }
 0x352   : > { %v841_v50 = vpop.eup %840 }
 0x353   : > { %708 = vpush %v841_v50 }
 0x384   : > { %s709_s13 = spop %708 }
 0x385   : > { %s473_s12 = smul.f32 %s709_s13, %s703_s14 }
 0x387   : > { %v474_v52 = vstv %s473_s12 }
 0x388   : > { %v475_v53 = vadd.f32 %v474_v52, %v466_v51 }
 0x38a   : > { %476 = vst [vmem:[%s1435_s8] sm:$0x1] %v475_v53 }
 0x38b PF: > { %s1101_s29 = smov 1   ;;  %s1596_s26 = sld [smem:[#allocation20_spill]] }
 0x38c   : > { %s1597_s5 = sld [smem:[#allocation21_spill]]  ;;  %478 = vrot.lane.b32.xlu0 %v1422_v24, %s1101_s29  ;;  %s506_s11 = sshll.u32 %s1432_s7, 4  ;;  %s507_s11 = int_to_ptr.vmem [resolvable:$true] %s506_s11 }
 0x38d   : > { %s1598_s22 = sld [smem:[#allocation26_spill]]  ;;  %s490_s14 = scalar_lea.sflag [#allocation6], %s1401_s21 }
 0x38e   : > { %s932_s1 = scalar_lea.vmem %s507_s11, 16  ;;  %s1102_s15 = smov [#allocation10]  }
 0x38f   : > { %p933_p12 = scmp.ne.s32.totalorder %s507_s11, %s932_s1  ;;  %s936_s9 = sshll.u32 %s1102_s15, 4  ;;  %s937_s9 = int_to_ptr.vmem [resolvable:$false] %s936_s9 }
 0x390   : > { %s938_s28 = scalar_lea.vmem %s937_s9, 32  ;;  %p939_p4 = scmp.lt.s32.totalorder %s507_s11, %s937_s9 }
 0x391   : > { %s693_s18 = sshll.u32 %s1596_s26, 4  ;;  %p940_p7 = scmp.lt.s32.totalorder %s938_s28, %s932_s1 }
 0x392   : > { %p1600_p3 = scmp.ne.s32.totalorder %s1597_s5, 0 }
 0x393   : > { %s1599_s30 = smov %s1598_s22  ;;  %s1458_s10 = scalar_lea.hbm %s1598_s22, %s693_s18 }
 0x394   : > { %p934_p5 = pnand %p933_p12, %p1600_p3  ;;  %p941_p10 = por %p940_p7, %p939_p4 }
 0x396   : > { %p935_p2 = pneg %p934_p5 }
 0x398   : > { %p942_p0 = pnand %p941_p10, %p935_p2 }
 0x39a   : > { %945 = shalt.err (!%p942_p0)
}
 0x39b   : > { %s946_s7 = scalar_lea.hbm %s1458_s10, 16  ;;  %s950_s6 = scalar_lea.hbm %s1599_s30, 32 }
 0x39c   : > { %p947_p6 = scmp.ne.s32.totalorder %s1458_s10, %s946_s7  ;;  %p951_p9 = scmp.lt.u32.totalorder %s1458_s10, %s1599_s30 }
 0x39d   : > { %p952_p8 = scmp.lt.u32.totalorder %s950_s6, %s946_s7  ;;  %p954_p12 = scmp.lt.u32.totalorder %s946_s7, %s1458_s10 }
 0x39e   : > { %p948_p11 = pnand %p947_p6, %p1600_p3 }
 0x39f   : > { %p953_p1 = por %p952_p8, %p951_p9 }
 0x3a0   : > { %p949_p13 = pneg %p948_p11 }
 0x3a1   : > { %p955_p5 = por %p954_p12, %p953_p1 }
 0x3a3   : > { %p956_p2 = pnand %p955_p5, %p949_p13 }
 0x3a5   : > { %959 = shalt.err (!%p956_p2)
}
 0x3a6   : > { %716 = dma.vmem_to_hbm [thread:$0]  (%p1600_p3), %s507_s11, 16, %s1458_s10, %s490_s14   ;;  %484 = vrot.lane.b32.xlu0 %v1414_v0, %s1101_s29 }
 0x3a7   : > { %s1601_s9 = sld [smem:[#allocation27_spill]]  ;;  %s519_s7 = sshll.u32 %s1435_s8, 4  ;;  %s520_s7 = int_to_ptr.vmem [resolvable:$true] %s519_s7 }
 0x3a8   : > { %s494_s13 = scalar_lea.sflag [#allocation12], %s1401_s21  ;;  %s960_s12 = scalar_lea.vmem %s520_s7, 16 }
 0x3a9   : > { %p961_p4 = scmp.ne.s32.totalorder %s520_s7, %s960_s12  ;;  %s1103_s6 = smov [#allocation11]  }
 0x3aa   : > { %s964_s27 = sshll.u32 %s1103_s6, 4  ;;  %s965_s27 = int_to_ptr.vmem [resolvable:$false] %s964_s27 }
 0x3ab   : > { %p962_p7 = pnand %p961_p4, %p1600_p3  ;;  %s966_s26 = scalar_lea.vmem %s965_s27, 32 }
 0x3ac   : > { %p967_p0 = scmp.lt.s32.totalorder %s520_s7, %s965_s27  ;;  %p968_p6 = scmp.lt.s32.totalorder %s966_s26, %s960_s12 }
 0x3ad   : > { %s1483_s28 = scalar_lea.hbm %s1601_s9, %s693_s18  ;;  %p963_p10 = pneg %p962_p7 }
 0x3ae   : > { %p969_p11 = por %p968_p6, %p967_p0 }
 0x3b0   : > { %p970_p13 = pnand %p969_p11, %p963_p10 }
 0x3b2   : > { %973 = shalt.err (!%p970_p13)
}
 0x3b3   : > { %s974_s21 = scalar_lea.hbm %s1483_s28, 16  ;;  %s978_s18 = scalar_lea.hbm %s1601_s9, 32 }
 0x3b4   : > { %p975_p9 = scmp.ne.s32.totalorder %s1483_s28, %s974_s21  ;;  %p979_p12 = scmp.lt.u32.totalorder %s1483_s28, %s1601_s9 }
 0x3b5   : > { %p980_p5 = scmp.lt.u32.totalorder %s978_s18, %s974_s21  ;;  %p982_p4 = scmp.lt.u32.totalorder %s974_s21, %s1483_s28 }
 0x3b6   : > { %p976_p8 = pnand %p975_p9, %p1600_p3 }
 0x3b7   : > { %p981_p2 = por %p980_p5, %p979_p12 }
 0x3b8   : > { %p977_p1 = pneg %p976_p8 }
 0x3b9   : > { %p983_p7 = por %p982_p4, %p981_p2 }
 0x3bb   : > { %p984_p10 = pnand %p983_p7, %p977_p1 }
 0x3bd   : > { %987 = shalt.err (!%p984_p10)
}
 0x3be   : > { %717 = dma.vmem_to_hbm [thread:$0]  (%p1600_p3), %s520_s7, 16, %s1483_s28, %s494_s13   ;;  %vm481_vm10 = vcmask 3072   ;;  %vm487_vm11 = vcmask 7168  }
 0x3fe   : > { %v479_v0 = vpop.permute.xlu0 %478 }
 0x3ff   : > { %482 = vst.msk [vmem:[#allocation2] sm:$0xf] %vm481_vm10, %v479_v0 }
 0x418   : > { %v485_v24 = vpop.permute.xlu0 %484 }
 0x419   : > { %488 = vst.msk [vmem:[#allocation3] sm:$0xff] %vm487_vm11, %v485_v24 }
 0x41a PF: > { %s1602_s14 = sld [smem:[#allocation18_spill]]  ;;  %s1603_s22 = sld [smem:[#allocation22_spill]] }
 0x41b   : > { %p738_p0 = scmp.ge.s32.totalorder %s1094_s25, 2 }
 0x420   : > { %s531_s1 = sand.u32 1, %s1602_s14   ;;  %p1604_p6 = scmp.ne.s32.totalorder %s1603_s22, 0 }
 0x421   : > { %s532_s15 = scalar_lea.sflag [#allocation6], %s531_s1 }
 0x422   : > { %p731_p11 = pnand %p738_p0, %p1604_p6 }
 0x424   : > { %1045 = dma.done.wait (!%p731_p11), %s532_s15, 16  }
 0x425   : > { %1047 = vsyncadd (!%p731_p11), %s532_s15, 4294967280  ;;  %s540_s5 = scalar_lea.sflag [#allocation12], %s531_s1 }
 0x426   : > { %1049 = dma.done.wait (!%p731_p11), %s540_s5, 16  }
 0x427   : > { %1051 = vsyncadd (!%p731_p11), %s540_s5, 4294967280  ;;  %s27_s25 = sadd.s32 1, %s1094_s25   ;;  %s1605_s28 = sld [smem:[#allocation23_spill]] }
 0x428   : > { %p24_p3 = scmp.ge.s32.totalorder %s27_s25, 6   ;;  %s1606_s7 = sld [smem:[#allocation24_spill]] }
 0x429   : > { %s1607_s15 = smov %s1058_s16  ;;  %s1608_s16 = smov %s1062_s17 }
 0x42a   : > { %s1609_s17 = smov %s1315_s4  ;;  %s1610_s18 = smov %s1070_s19 }
 0x42b   : > { %s1611_s19 = smov %s1074_s20  ;;  %s1612_s20 = smov %s1318_s3 }
 0x42c   : > { %s1613_s21 = smov %s1086_s23  ;;  %s1614_s22 = smov %s1090_s24 }
 0x42d   : > { %s1615_s23 = smov %s1605_s28  ;;  %26 = sbr.rel (!%p24_p3) target bundleno = 17 (0x11), region = 127 }
 0x42e   : > { %s1616_s24 = smov %s1606_s7 }
 0x434   :  { %544 = vsyncpa [#allocation5], 1 }
 0x435   :  { %546 = vsyncpa [#allocation5 + $0x1], 1 }
 0x436   :  { %547 = vsyncpa [#allocation8], 1 }
 0x437   :  { %549 = vsyncpa [#allocation8 + $0x1], 1 }
 0x438   :  { %550 = vsyncpa [#allocation6], 1 }
 0x439   :  { %552 = vsyncpa [#allocation6 + $0x1], 1 }
 0x43a   :  { %553 = vsyncpa [#allocation12], 1 }
 0x43b   :  { %555 = vsyncpa [#allocation12 + $0x1], 1 }

</bundles_post_ra>
